<compile_context>
chip_gen: v6e
topology: v6e:2x2x1
jax: 0.10.0
libtpu: 0.0.40
codegen_flags: <defaults>
</compile_context>

<pallas_src>
import jax
import jax.numpy as jnp
from jax.experimental import pallas as pl
from jax.experimental.pallas import tpu as pltpu

NUM_POINTS_POINT_CLOUD = 100
RANDOM_INPUT_NUM = 512
N_LABEL = 3
IN_DIM = RANDOM_INPUT_NUM + N_LABEL    # 515
HID = 256
OUT_DIM = NUM_POINTS_POINT_CLOUD * 2   # 200
OUT_PAD = 256                          # lane-dense output width (sliced to 200)
LABEL_PAD = 8                          # label columns padded 3 -> 8
LEAKY_SLOPE = 0.2


def _round_up(x, m):
    return (x + m - 1) // m * m


def generator_kernel(noise_ref, lab_ref, w0n_ref, w0l_ref, wh_ref, b_ref, o_ref):
    """5-layer MLP on one batch tile; bf16 weights/inputs, f32 accumulation."""

    def leaky_relu(h):
        return jnp.where(h > 0, h, LEAKY_SLOPE * h)

    # Layer 0: Linear(515 -> 256).  K split as one clean K=512 MXU matmul
    # (noise, bf16) plus three VPU broadcast multiply-adds for the label
    # columns (f32).  Dropout = identity in eval mode.
    h = (jnp.dot(noise_ref[...], w0n_ref[...],
                 preferred_element_type=jnp.float32)
         + b_ref[0:1, :])
    for j in range(N_LABEL):
        h = h + lab_ref[:, j:j + 1] * w0l_ref[j:j + 1, :]

    # Layers 1..3: Linear(256 -> 256) + LeakyReLU(0.2); Dropout = identity.
    for i in range(3):
        h = leaky_relu(
            jnp.dot(h.astype(jnp.bfloat16), wh_ref[i],
                    preferred_element_type=jnp.float32)
            + b_ref[i + 1:i + 2, :])

    # Layer 4: Linear(256 -> 200), computed 256-wide (cols 200..255 are zero).
    o_ref[...] = (jnp.dot(h.astype(jnp.bfloat16), wh_ref[3],
                          preferred_element_type=jnp.float32)
                  + b_ref[4:5, :])


def pack_params(ws, bs):
    """Pack/pad raw (in,out)-layout f32 weights into the kernel's layout."""
    w0, w1, w2, w3, w4 = ws
    b0, b1, b2, b3, b4 = bs
    # Noise part of layer 0: bf16, feeds the MXU.
    w0n = w0[:RANDOM_INPUT_NUM].astype(jnp.bfloat16)                     # (512, 256)
    # Label part of layer 0: kept f32 (tiny, used on the VPU).
    w0l = jnp.zeros((LABEL_PAD, HID), jnp.float32)
    w0l = w0l.at[:N_LABEL].set(w0[RANDOM_INPUT_NUM:])                    # (8, 256)
    # Hidden layers + padded output layer, stacked, bf16.
    w4p = jnp.zeros((HID, OUT_PAD), jnp.float32).at[:, :OUT_DIM].set(w4)
    wh = jnp.stack([w1, w2, w3, w4p], axis=0).astype(jnp.bfloat16)       # (4, 256, 256)
    # Biases, f32.
    b4p = jnp.zeros((OUT_PAD,), jnp.float32).at[:OUT_DIM].set(b4)
    bias = jnp.stack([b0, b1, b2, b3, b4p], axis=0)                      # (5, 256)
    return w0n, w0l, wh, bias


def init_params(key):
    """Deterministic PyTorch-style Linear init: U(-1/sqrt(fan_in), 1/sqrt(fan_in))."""
    dims = [(IN_DIM, HID), (HID, HID), (HID, HID), (HID, HID), (HID, OUT_DIM)]
    ws, bs = [], []
    for i, (fin, fout) in enumerate(dims):
        kw, kb = jax.random.split(jax.random.fold_in(key, i))
        bound = 1.0 / float(fin) ** 0.5
        ws.append(jax.random.uniform(kw, (fin, fout), jnp.float32, -bound, bound))
        bs.append(jax.random.uniform(kb, (fout,), jnp.float32, -bound, bound))
    return pack_params(ws, bs)


@jax.jit
def generator_forward(noise, c_label, params):
    w0n, w0l, wh, bias = params

    # Mirror `if c_label.dim() == 1: c_label = c_label.unsqueeze(1)`
    if c_label.ndim == 1:
        c_label = c_label[:, None]
    B = noise.shape[0]

    # bf16 activation stream (halves the dominant 512-wide noise row traffic);
    # labels stay f32 (tiny) for the VPU broadcast MACs.
    noise_b = noise.astype(jnp.bfloat16)
    lab_f = c_label.astype(jnp.float32)
    if lab_f.shape[1] != LABEL_PAD:
        lab_f = jnp.pad(lab_f, ((0, 0), (0, LABEL_PAD - lab_f.shape[1])))

    # Row tile: sublane-aligned, up to 256 rows.  For B > 16 force >= 2 grid
    # steps so the "parallel" batch axis can shard across v7x's 2 TensorCores.
    B8 = _round_up(B, 8)
    if B8 <= 16:
        TM = B8
    else:
        TM = min(256, _round_up(pl.cdiv(B8, 2), 8))
    B_pad = _round_up(B, TM)

    # Only materialize a pad copy when actually needed (aligned B: zero cost),
    # and do it on the already-bf16 stream.
    if B_pad != B:
        noise_b = jnp.pad(noise_b, ((0, B_pad - B), (0, 0)))
        lab_f = jnp.pad(lab_f, ((0, B_pad - B), (0, 0)))

    flops = (2 * B_pad * (RANDOM_INPUT_NUM * HID + 3 * HID * HID + HID * OUT_PAD)
             + 2 * B_pad * N_LABEL * HID)
    bytes_accessed = (noise_b.size * 2 + lab_f.size * 4
                      + w0n.size * 2 + wh.size * 2
                      + w0l.size * 4 + bias.size * 4
                      + B_pad * OUT_PAD * 4)

    out = pl.pallas_call(
        generator_kernel,
        out_shape=jax.ShapeDtypeStruct((B_pad, OUT_PAD), jnp.float32),
        grid=(B_pad // TM,),
        in_specs=[
            pl.BlockSpec((TM, RANDOM_INPUT_NUM), lambda i: (i, 0)),   # noise rows (bf16)
            pl.BlockSpec((TM, LABEL_PAD), lambda i: (i, 0)),          # label rows (f32)
            pl.BlockSpec((RANDOM_INPUT_NUM, HID), lambda i: (0, 0)),  # w0 noise-K (bf16)
            pl.BlockSpec((LABEL_PAD, HID), lambda i: (0, 0)),         # w0 label rows (f32)
            pl.BlockSpec((4, HID, HID), lambda i: (0, 0, 0)),         # hidden + out W (bf16)
            pl.BlockSpec((5, HID), lambda i: (0, 0)),                 # all biases (f32)
        ],
        out_specs=pl.BlockSpec((TM, OUT_PAD), lambda i: (i, 0)),
        compiler_params=pltpu.CompilerParams(
            dimension_semantics=("parallel",)),
        cost_estimate=pl.CostEstimate(flops=flops, transcendentals=0,
                                      bytes_accessed=bytes_accessed),
    )(noise_b, lab_f, w0n, w0l, wh, bias)

    # Consumers that can take the padded lane-dense (B_pad, 256) view should
    # skip this slice; kept here to match the module's (B, 200) output.
    return out[:B, :OUT_DIM]


if __name__ == "__main__":
    key = jax.random.PRNGKey(0)
    k_noise, k_label, k_param = jax.random.split(key, 3)

    B = 2
    noise = jax.random.normal(k_noise, (B, RANDOM_INPUT_NUM), dtype=jnp.float32)
    c_label = jax.random.normal(k_label, (B, N_LABEL), dtype=jnp.float32)
    params = init_params(k_param)

    out = generator_forward(noise, c_label, params)
    out = jax.block_until_ready(out)

    assert out.shape == (B, OUT_DIM), out.shape
    assert out.dtype == jnp.float32
    assert bool(jnp.all(jnp.isfinite(out)))

    # Pure-JAX reference with the same packed bf16 weights / f32 accumulation.
    w0n, w0l, wh, bias = params
    nb = noise.astype(jnp.bfloat16)
    h = jnp.dot(nb, w0n, preferred_element_type=jnp.float32) + bias[0]
    h = h + jnp.dot(c_label.astype(jnp.float32), w0l[:N_LABEL])
    for i in range(3):
        h = jnp.dot(h.astype(jnp.bfloat16), wh[i],
                    preferred_element_type=jnp.float32) + bias[i + 1]
        h = jnp.where(h > 0, h, LEAKY_SLOPE * h)
    ref = (jnp.dot(h.astype(jnp.bfloat16), wh[3],
                   preferred_element_type=jnp.float32) + bias[4])[:, :OUT_DIM]
    assert jnp.allclose(out, ref, rtol=2e-2, atol=2e-2), \
        float(jnp.max(jnp.abs(out - ref)))

    print("KERNEL_OK")
</pallas_src>

<mosaic_0001>
module attributes {stable_mosaic.version = 11 : i64} {
  func.func @generator_kernel(%arg0: i32, %arg1: memref<8x512xbf16, #tpu.memory_space<vmem>>, %arg2: memref<8x8xf32, #tpu.memory_space<vmem>>, %arg3: memref<512x256xbf16, #tpu.memory_space<vmem>>, %arg4: memref<8x256xf32, #tpu.memory_space<vmem>>, %arg5: memref<4x256x256xbf16, #tpu.memory_space<vmem>>, %arg6: memref<5x256xf32, #tpu.memory_space<vmem>>, %arg7: memref<8x256xf32, #tpu.memory_space<vmem>>) attributes {dimension_semantics = [#tpu.dimension_semantics<parallel>], iteration_bounds = array<i64: 1>, scalar_prefetch = 0 : i64, scratch_operands = 0 : i64, tpu.core_type = #tpu.core_type<tc>, window_params = [{transform_indices = @transform_0, window_bounds = array<i64: 8, 512>}, {transform_indices = @transform_1, window_bounds = array<i64: 8, 8>}, {pipeline_mode = #tpu.pipeline_mode<synchronous>, transform_indices = @transform_2, window_bounds = array<i64: 512, 256>}, {pipeline_mode = #tpu.pipeline_mode<synchronous>, transform_indices = @transform_3, window_bounds = array<i64: 8, 256>}, {pipeline_mode = #tpu.pipeline_mode<synchronous>, transform_indices = @transform_4, window_bounds = array<i64: 4, 256, 256>}, {pipeline_mode = #tpu.pipeline_mode<synchronous>, transform_indices = @transform_5, window_bounds = array<i64: 5, 256>}, {transform_indices = @transform_6, window_bounds = array<i64: 8, 256>}]} {
    %c0 = arith.constant 0 : index
    %c0_0 = arith.constant 0 : index
    %0 = vector.load %arg1[%c0, %c0_0] : memref<8x512xbf16, #tpu.memory_space<vmem>>, vector<8x512xbf16>
    %c0_1 = arith.constant 0 : index
    %c0_2 = arith.constant 0 : index
    %1 = vector.load %arg3[%c0_1, %c0_2] : memref<512x256xbf16, #tpu.memory_space<vmem>>, vector<512x256xbf16>
    %cst = arith.constant dense<0.000000e+00> : vector<8x256xf32>
    %2 = tpu.matmul %0, %1, %cst {dimension_numbers = #tpu.dot_dimension_numbers<[1], [0], [0], [1], [0, 0, 1, 1], [], []>} : vector<8x512xbf16>, vector<512x256xbf16>, vector<8x256xf32> -> vector<8x256xf32>
    %c0_3 = arith.constant 0 : index
    %c0_4 = arith.constant 0 : index
    %3 = vector.load %arg6[%c0_3, %c0_4] : memref<5x256xf32, #tpu.memory_space<vmem>>, vector<1x256xf32>
    %4 = vector.broadcast %3 : vector<1x256xf32> to vector<8x256xf32>
    %5 = arith.addf %2, %4 : vector<8x256xf32>
    %c0_5 = arith.constant 0 : index
    %c0_6 = arith.constant 0 : index
    %6 = vector.load %arg2[%c0_5, %c0_6] : memref<8x8xf32, #tpu.memory_space<vmem>>, vector<8x1xf32>
    %c0_7 = arith.constant 0 : index
    %c0_8 = arith.constant 0 : index
    %7 = vector.load %arg4[%c0_7, %c0_8] : memref<8x256xf32, #tpu.memory_space<vmem>>, vector<1x256xf32>
    %8 = vector.broadcast %6 : vector<8x1xf32> to vector<8x256xf32>
    %9 = vector.broadcast %7 : vector<1x256xf32> to vector<8x256xf32>
    %10 = arith.mulf %8, %9 : vector<8x256xf32>
    %11 = arith.addf %5, %10 : vector<8x256xf32>
    %c0_9 = arith.constant 0 : index
    %c1 = arith.constant 1 : index
    %12 = vector.load %arg2[%c0_9, %c1] : memref<8x8xf32, #tpu.memory_space<vmem>>, vector<8x1xf32>
    %c1_10 = arith.constant 1 : index
    %c0_11 = arith.constant 0 : index
    %13 = vector.load %arg4[%c1_10, %c0_11] : memref<8x256xf32, #tpu.memory_space<vmem>>, vector<1x256xf32>
    %14 = vector.broadcast %12 : vector<8x1xf32> to vector<8x256xf32>
    %15 = vector.broadcast %13 : vector<1x256xf32> to vector<8x256xf32>
    %16 = arith.mulf %14, %15 : vector<8x256xf32>
    %17 = arith.addf %11, %16 : vector<8x256xf32>
    %c0_12 = arith.constant 0 : index
    %c2 = arith.constant 2 : index
    %18 = vector.load %arg2[%c0_12, %c2] : memref<8x8xf32, #tpu.memory_space<vmem>>, vector<8x1xf32>
    %c2_13 = arith.constant 2 : index
    %c0_14 = arith.constant 0 : index
    %19 = vector.load %arg4[%c2_13, %c0_14] : memref<8x256xf32, #tpu.memory_space<vmem>>, vector<1x256xf32>
    %20 = vector.broadcast %18 : vector<8x1xf32> to vector<8x256xf32>
    %21 = vector.broadcast %19 : vector<1x256xf32> to vector<8x256xf32>
    %22 = arith.mulf %20, %21 : vector<8x256xf32>
    %23 = arith.addf %17, %22 : vector<8x256xf32>
    %24 = arith.truncf %23 : vector<8x256xf32> to vector<8x256xbf16>
    %c0_15 = arith.constant 0 : index
    %c0_16 = arith.constant 0 : index
    %c0_17 = arith.constant 0 : index
    %25 = vector.load %arg5[%c0_15, %c0_16, %c0_17] : memref<4x256x256xbf16, #tpu.memory_space<vmem>>, vector<1x256x256xbf16>
    %26 = vector.shape_cast %25 : vector<1x256x256xbf16> to vector<256x256xbf16>
    %cst_18 = arith.constant dense<0.000000e+00> : vector<8x256xf32>
    %27 = tpu.matmul %24, %26, %cst_18 {dimension_numbers = #tpu.dot_dimension_numbers<[1], [0], [0], [1], [0, 0, 1, 1], [], []>} : vector<8x256xbf16>, vector<256x256xbf16>, vector<8x256xf32> -> vector<8x256xf32>
    %c1_19 = arith.constant 1 : index
    %c0_20 = arith.constant 0 : index
    %28 = vector.load %arg6[%c1_19, %c0_20] : memref<5x256xf32, #tpu.memory_space<vmem>>, vector<1x256xf32>
    %29 = vector.broadcast %28 : vector<1x256xf32> to vector<8x256xf32>
    %30 = arith.addf %27, %29 : vector<8x256xf32>
    %cst_21 = arith.constant 0.000000e+00 : f32
    %31 = vector.broadcast %cst_21 : f32 to vector<8x256xf32>
    %32 = arith.cmpf ogt, %30, %31 : vector<8x256xf32>
    %cst_22 = arith.constant 2.000000e-01 : f32
    %33 = vector.broadcast %cst_22 : f32 to vector<8x256xf32>
    %34 = arith.mulf %33, %30 : vector<8x256xf32>
    %35 = arith.select %32, %30, %34 : vector<8x256xi1>, vector<8x256xf32>
    %36 = arith.truncf %35 : vector<8x256xf32> to vector<8x256xbf16>
    %c1_23 = arith.constant 1 : index
    %c0_24 = arith.constant 0 : index
    %c0_25 = arith.constant 0 : index
    %37 = vector.load %arg5[%c1_23, %c0_24, %c0_25] : memref<4x256x256xbf16, #tpu.memory_space<vmem>>, vector<1x256x256xbf16>
    %38 = vector.shape_cast %37 : vector<1x256x256xbf16> to vector<256x256xbf16>
    %cst_26 = arith.constant dense<0.000000e+00> : vector<8x256xf32>
    %39 = tpu.matmul %36, %38, %cst_26 {dimension_numbers = #tpu.dot_dimension_numbers<[1], [0], [0], [1], [0, 0, 1, 1], [], []>} : vector<8x256xbf16>, vector<256x256xbf16>, vector<8x256xf32> -> vector<8x256xf32>
    %c2_27 = arith.constant 2 : index
    %c0_28 = arith.constant 0 : index
    %40 = vector.load %arg6[%c2_27, %c0_28] : memref<5x256xf32, #tpu.memory_space<vmem>>, vector<1x256xf32>
    %41 = vector.broadcast %40 : vector<1x256xf32> to vector<8x256xf32>
    %42 = arith.addf %39, %41 : vector<8x256xf32>
    %cst_29 = arith.constant 0.000000e+00 : f32
    %43 = vector.broadcast %cst_29 : f32 to vector<8x256xf32>
    %44 = arith.cmpf ogt, %42, %43 : vector<8x256xf32>
    %cst_30 = arith.constant 2.000000e-01 : f32
    %45 = vector.broadcast %cst_30 : f32 to vector<8x256xf32>
    %46 = arith.mulf %45, %42 : vector<8x256xf32>
    %47 = arith.select %44, %42, %46 : vector<8x256xi1>, vector<8x256xf32>
    %48 = arith.truncf %47 : vector<8x256xf32> to vector<8x256xbf16>
    %c2_31 = arith.constant 2 : index
    %c0_32 = arith.constant 0 : index
    %c0_33 = arith.constant 0 : index
    %49 = vector.load %arg5[%c2_31, %c0_32, %c0_33] : memref<4x256x256xbf16, #tpu.memory_space<vmem>>, vector<1x256x256xbf16>
    %50 = vector.shape_cast %49 : vector<1x256x256xbf16> to vector<256x256xbf16>
    %cst_34 = arith.constant dense<0.000000e+00> : vector<8x256xf32>
    %51 = tpu.matmul %48, %50, %cst_34 {dimension_numbers = #tpu.dot_dimension_numbers<[1], [0], [0], [1], [0, 0, 1, 1], [], []>} : vector<8x256xbf16>, vector<256x256xbf16>, vector<8x256xf32> -> vector<8x256xf32>
    %c3 = arith.constant 3 : index
    %c0_35 = arith.constant 0 : index
    %52 = vector.load %arg6[%c3, %c0_35] : memref<5x256xf32, #tpu.memory_space<vmem>>, vector<1x256xf32>
    %53 = vector.broadcast %52 : vector<1x256xf32> to vector<8x256xf32>
    %54 = arith.addf %51, %53 : vector<8x256xf32>
    %cst_36 = arith.constant 0.000000e+00 : f32
    %55 = vector.broadcast %cst_36 : f32 to vector<8x256xf32>
    %56 = arith.cmpf ogt, %54, %55 : vector<8x256xf32>
    %cst_37 = arith.constant 2.000000e-01 : f32
    %57 = vector.broadcast %cst_37 : f32 to vector<8x256xf32>
    %58 = arith.mulf %57, %54 : vector<8x256xf32>
    %59 = arith.select %56, %54, %58 : vector<8x256xi1>, vector<8x256xf32>
    %60 = arith.truncf %59 : vector<8x256xf32> to vector<8x256xbf16>
    %c3_38 = arith.constant 3 : index
    %c0_39 = arith.constant 0 : index
    %c0_40 = arith.constant 0 : index
    %61 = vector.load %arg5[%c3_38, %c0_39, %c0_40] : memref<4x256x256xbf16, #tpu.memory_space<vmem>>, vector<1x256x256xbf16>
    %62 = vector.shape_cast %61 : vector<1x256x256xbf16> to vector<256x256xbf16>
    %cst_41 = arith.constant dense<0.000000e+00> : vector<8x256xf32>
    %63 = tpu.matmul %60, %62, %cst_41 {dimension_numbers = #tpu.dot_dimension_numbers<[1], [0], [0], [1], [0, 0, 1, 1], [], []>} : vector<8x256xbf16>, vector<256x256xbf16>, vector<8x256xf32> -> vector<8x256xf32>
    %c4 = arith.constant 4 : index
    %c0_42 = arith.constant 0 : index
    %64 = vector.load %arg6[%c4, %c0_42] : memref<5x256xf32, #tpu.memory_space<vmem>>, vector<1x256xf32>
    %65 = vector.broadcast %64 : vector<1x256xf32> to vector<8x256xf32>
    %66 = arith.addf %63, %65 : vector<8x256xf32>
    %c0_43 = arith.constant 0 : index
    %c0_44 = arith.constant 0 : index
    %67 = vector.load %arg7[%c0_43, %c0_44] : memref<8x256xf32, #tpu.memory_space<vmem>>, vector<8x256xf32>
    tpu.vector_store %arg7[%c0_43, %c0_44], %66 {strides = array<i32>} : memref<8x256xf32, #tpu.memory_space<vmem>>, vector<8x256xf32>,
    return
  }
  func.func @transform_0(%arg0: i32) -> (i32, i32) {
    %c0_i32 = arith.constant 0 : i32
    %c0_i32_0 = arith.constant 0 : i32
    return %arg0, %c0_i32 : i32, i32
  }
  func.func @transform_1(%arg0: i32) -> (i32, i32) {
    %c0_i32 = arith.constant 0 : i32
    %c0_i32_0 = arith.constant 0 : i32
    return %arg0, %c0_i32 : i32, i32
  }
  func.func @transform_2(%arg0: i32) -> (i32, i32) {
    %c0_i32 = arith.constant 0 : i32
    %c0_i32_0 = arith.constant 0 : i32
    %c0_i32_1 = arith.constant 0 : i32
    return %c0_i32, %c0_i32_0 : i32, i32
  }
  func.func @transform_3(%arg0: i32) -> (i32, i32) {
    %c0_i32 = arith.constant 0 : i32
    %c0_i32_0 = arith.constant 0 : i32
    %c0_i32_1 = arith.constant 0 : i32
    return %c0_i32, %c0_i32_0 : i32, i32
  }
  func.func @transform_4(%arg0: i32) -> (i32, i32, i32) {
    %c0_i32 = arith.constant 0 : i32
    %c0_i32_0 = arith.constant 0 : i32
    %c0_i32_1 = arith.constant 0 : i32
    %c0_i32_2 = arith.constant 0 : i32
    return %c0_i32, %c0_i32_0, %c0_i32_1 : i32, i32, i32
  }
  func.func @transform_5(%arg0: i32) -> (i32, i32) {
    %c0_i32 = arith.constant 0 : i32
    %c0_i32_0 = arith.constant 0 : i32
    %c0_i32_1 = arith.constant 0 : i32
    return %c0_i32, %c0_i32_0 : i32, i32
  }
  func.func @transform_6(%arg0: i32) -> (i32, i32) {
    %c0_i32 = arith.constant 0 : i32
    %c0_i32_0 = arith.constant 0 : i32
    return %arg0, %c0_i32 : i32, i32
  }
}

</mosaic_0001>

<bundles_post_ra>
// kernel: generator_forward.1
= control target key start
LH: loop header
LB: loop body
LE: loop exit
PB: predicated region body
PF: predicated region fallthrough
CT: control target
= control target key end

     0   :  { %11 = vsyncpa [#allocation3], 0  ;;  %s2288_s0 = inlined_call_operand.vmem [shape: bf16[8,512], index: 0, kind: input, shape index: {}]   ;;  %s2289_s1 = inlined_call_operand.vmem [shape: f32[8,8], index: 1, kind: input, shape index: {}]   ;;  %s2290_s2 = inlined_call_operand.hbm [shape: bf16[512,256], index: 2, kind: input, shape index: {}]   ;;  %s2291_s3 = inlined_call_operand.vmem [shape: f32[8,256], index: 3, kind: input, shape index: {}]   ;;  %s2292_s4 = inlined_call_operand.hbm [shape: bf16[4,256,256], index: 4, kind: input, shape index: {}]   ;;  %s2293_s5 = inlined_call_operand.vmem [shape: f32[5,256], index: 5, kind: input, shape index: {}]   ;;  %s2294_s6 = inlined_call_operand.vmem [shape: f32[8,256], index: 6, kind: output, shape index: {}]  }
   0x1   :  { %12 = vsyncpa [#allocation5], 0  ;;  %s2179_s21 = smov [#allocation2]  }
   0x2   :  { %s22_s22 = sshll.u32 %s2179_s21, 4  ;;  %s23_s22 = int_to_ptr.vmem [resolvable:$true] %s22_s22 }
   0x3   :  { %s2143_s23 = scalar_lea.vmem %s23_s22, 8192  ;;  %p2148_p1 = scmp.lt.s32.totalorder %s23_s22, %s23_s22 }
   0x4   :  { %p2144_p0 = scmp.ne.s32.totalorder %s23_s22, %s2143_s23  ;;  %p2149_p2 = scmp.lt.s32.totalorder %s2143_s23, %s2143_s23 }
   0x6   :  { %p2150_p3 = por %p2149_p2, %p2148_p1 }
   0x8   :  { %p2151_p4 = pnand %p2150_p3, %p2144_p0 }
   0xa   :  { %2154 = shalt.err (!%p2151_p4)
}
   0xb   :  { %s2180_s24 = smov 128   ;;  %s2181_s25 = smov 8  }
   0xc   :  { %28 = dma.hbm_to_vmem [thread:$0]  %s2290_s2, 8192, %s23_s22, [#allocation3], %s2180_s24, %s2180_s24, %s2181_s25  }
   0xd   :  { %s2182_s28 = smov [#allocation4]  }
   0xe   :  { %s36_s29 = sshll.u32 %s2182_s28, 4  ;;  %s37_s29 = int_to_ptr.vmem [resolvable:$true] %s36_s29 }
   0xf   :  { %s2163_s30 = scalar_lea.vmem %s37_s29, 16384  ;;  %p2168_p6 = scmp.lt.s32.totalorder %s37_s29, %s37_s29 }
  0x10   :  { %p2164_p5 = scmp.ne.s32.totalorder %s37_s29, %s2163_s30  ;;  %p2169_p7 = scmp.lt.s32.totalorder %s2163_s30, %s2163_s30 }
  0x12   :  { %p2170_p8 = por %p2169_p7, %p2168_p6 }
  0x14   :  { %p2171_p9 = pnand %p2170_p8, %p2164_p5 }
  0x16   :  { %2174 = shalt.err (!%p2171_p9)
}
  0x17   :  { %42 = dma.hbm_to_vmem [thread:$0]  %s2292_s4, 16384, %s37_s29, [#allocation5], %s2180_s24, %s2180_s24, %s2181_s25  }
  0x18   :  { %2175 = dma.done.wait [#allocation3], 8192  }
  0x19   :  { %2176 = vsyncadd [#allocation3], 4294959104 }
  0x1a   :  { %2177 = dma.done.wait [#allocation5], 16384  }
  0x1b   :  { %2178 = vsyncadd [#allocation5], 4294950912  ;;  %v2183_v0 = vmov 0   ;;  %v2184_v1 = vmov 2   ;;  %v1843_v2 = vld [vmem:[#allocation2 + $0x74] ss:$8 sps:$4 sm:$0xff]  }
  0x1c   :  { %1839 = vset.pattern.permute.xlu0 %v2183_v0  ;;  %1841 = vset.pattern.permute.xlu1 %v2184_v1  ;;  %v1845_v3 = vld [vmem:[#allocation2 + $0x174] ss:$8 sps:$4 sm:$0xff]   ;;  %v1847_v4 = vld [vmem:[#allocation2 + $0x70] ss:$8 sps:$4 sm:$0xff]   ;;  %v1849_v6 = vld [vmem:[#allocation2 + $0x64] ss:$8 sps:$4 sm:$0xff]  }
  0x1d   :  { %463 = vmatprep.subr.bf16.mxu0 %v1843_v2  ;;  %v1848_v5 = vld [vmem:[#allocation2 + $0x170] ss:$8 sps:$4 sm:$0xff]   ;;  %504 = vmatprep.subr.bf16.mxu1 %v1845_v3  ;;  %v1851_v7 = vld [vmem:[#allocation2 + $0x164] ss:$8 sps:$4 sm:$0xff]   ;;  %v1853_v8 = vld [vmem:[#allocation2 + $0x60] ss:$8 sps:$4 sm:$0xff]  }
  0x1e   :  { %464 = vmatpush1.bf16.msra.mxu0 %v1847_v4  ;;  %505 = vmatpush1.bf16.msra.mxu1 %v1848_v5  ;;  %v1854_v9 = vld [vmem:[#allocation2 + $0x160] ss:$8 sps:$4 sm:$0xff]   ;;  %v1855_v10 = vld [vmem:[#allocation2 + $0x54] ss:$8 sps:$4 sm:$0xff]   ;;  %v1859_v12 = vld [vmem:[#allocation2 + $0x50] ss:$8 sps:$4 sm:$0xff]  }
  0x1f   :  { %465 = vmatprep.subr.bf16.mxu0 %v1849_v6  ;;  %506 = vmatprep.subr.bf16.mxu1 %v1851_v7  ;;  %v1857_v11 = vld [vmem:[#allocation2 + $0x154] ss:$8 sps:$4 sm:$0xff]   ;;  %v1860_v13 = vld [vmem:[#allocation2 + $0x150] ss:$8 sps:$4 sm:$0xff]   ;;  %v1861_v14 = vld [vmem:[#allocation2 + $0x44] ss:$8 sps:$4 sm:$0xff]  }
  0x20   :  { %v1863_v15 = vld [vmem:[#allocation2 + $0x144] ss:$8 sps:$4 sm:$0xff]   ;;  %v1865_v16 = vld [vmem:[#allocation2 + $0x40] ss:$8 sps:$4 sm:$0xff]   ;;  %v1867_v18 = vld [vmem:[#allocation2 + $0x34] ss:$8 sps:$4 sm:$0xff]  }
  0x21   :  { %v1866_v17 = vld [vmem:[#allocation2 + $0x140] ss:$8 sps:$4 sm:$0xff]   ;;  %v1869_v19 = vld [vmem:[#allocation2 + $0x134] ss:$8 sps:$4 sm:$0xff]   ;;  %v1871_v20 = vld [vmem:[#allocation2 + $0x30] ss:$8 sps:$4 sm:$0xff]  }
  0x22   :  { %466 = vmatpush1.bf16.msra.mxu0 %v1853_v8  ;;  %507 = vmatpush1.bf16.msra.mxu1 %v1854_v9  ;;  %v1872_v21 = vld [vmem:[#allocation2 + $0x130] ss:$8 sps:$4 sm:$0xff]   ;;  %v1873_v22 = vld [vmem:[#allocation2 + $0x24] ss:$8 sps:$4 sm:$0xff]   ;;  %v1877_v24 = vld [vmem:[#allocation2 + $0x20] ss:$8 sps:$4 sm:$0xff]  }
  0x23   :  { %467 = vmatprep.subr.bf16.mxu0 %v1855_v10  ;;  %508 = vmatprep.subr.bf16.mxu1 %v1857_v11  ;;  %v1875_v23 = vld [vmem:[#allocation2 + $0x124] ss:$8 sps:$4 sm:$0xff]   ;;  %v1878_v25 = vld [vmem:[#allocation2 + $0x120] ss:$8 sps:$4 sm:$0xff]   ;;  %v1879_v26 = vld [vmem:[#allocation2 + $0x14] ss:$8 sps:$4 sm:$0xff]  }
  0x24   :  { %v1881_v27 = vld [vmem:[#allocation2 + $0x114] ss:$8 sps:$4 sm:$0xff]   ;;  %v1883_v28 = vld [vmem:[#allocation2 + $0x10] ss:$8 sps:$4 sm:$0xff]   ;;  %v1885_v30 = vld [vmem:[#allocation2 + $0x4] ss:$8 sps:$4 sm:$0xff]  }
  0x25   :  { %v1884_v29 = vld [vmem:[#allocation2 + $0x110] ss:$8 sps:$4 sm:$0xff]   ;;  %v1887_v31 = vld [vmem:[#allocation2 + $0x104] ss:$8 sps:$4 sm:$0xff]   ;;  %v1889_v32 = vld [vmem:[#allocation2] ss:$8 sps:$4 sm:$0xff]  }
  0x26   :  { %468 = vmatpush1.bf16.msra.mxu0 %v1859_v12  ;;  %509 = vmatpush1.bf16.msra.mxu1 %v1860_v13  ;;  %v1890_v33 = vld [vmem:[#allocation2 + $0x100] ss:$8 sps:$4 sm:$0xff]   ;;  %v1891_v34 = vld [vmem:[#allocation2 + $0xf4] ss:$8 sps:$4 sm:$0xff]   ;;  %v1895_v36 = vld [vmem:[#allocation2 + $0xf0] ss:$8 sps:$4 sm:$0xff]  }
  0x27   :  { %469 = vmatprep.subr.bf16.mxu0 %v1861_v14  ;;  %510 = vmatprep.subr.bf16.mxu1 %v1863_v15  ;;  %v1893_v35 = vld [vmem:[#allocation2 + $0x1f4] ss:$8 sps:$4 sm:$0xff]   ;;  %v1896_v37 = vld [vmem:[#allocation2 + $0x1f0] ss:$8 sps:$4 sm:$0xff]   ;;  %v1897_v38 = vld [vmem:[#allocation2 + $0xe4] ss:$8 sps:$4 sm:$0xff]  }
  0x28   :  { %v1899_v39 = vld [vmem:[#allocation2 + $0x1e4] ss:$8 sps:$4 sm:$0xff]   ;;  %v1901_v40 = vld [vmem:[#allocation2 + $0xe0] ss:$8 sps:$4 sm:$0xff]   ;;  %v1903_v42 = vld [vmem:[#allocation2 + $0xd4] ss:$8 sps:$4 sm:$0xff]  }
  0x29   :  { %v1902_v41 = vld [vmem:[#allocation2 + $0x1e0] ss:$8 sps:$4 sm:$0xff]   ;;  %v1905_v43 = vld [vmem:[#allocation2 + $0x1d4] ss:$8 sps:$4 sm:$0xff]   ;;  %v1907_v44 = vld [vmem:[#allocation2 + $0xd0] ss:$8 sps:$4 sm:$0xff]  }
  0x2a   :  { %470 = vmatpush1.bf16.msra.mxu0 %v1865_v16  ;;  %511 = vmatpush1.bf16.msra.mxu1 %v1866_v17  ;;  %v1908_v45 = vld [vmem:[#allocation2 + $0x1d0] ss:$8 sps:$4 sm:$0xff]   ;;  %v1909_v46 = vld [vmem:[#allocation2 + $0xc4] ss:$8 sps:$4 sm:$0xff]   ;;  %v1913_v48 = vld [vmem:[#allocation2 + $0xc0] ss:$8 sps:$4 sm:$0xff]  }
  0x2b   :  { %471 = vmatprep.subr.bf16.mxu0 %v1867_v18  ;;  %512 = vmatprep.subr.bf16.mxu1 %v1869_v19  ;;  %v1911_v47 = vld [vmem:[#allocation2 + $0x1c4] ss:$8 sps:$4 sm:$0xff]   ;;  %v1914_v50 = vld [vmem:[#allocation2 + $0x1c0] ss:$8 sps:$4 sm:$0xff]   ;;  %v1915_v53 = vld [vmem:[#allocation2 + $0xb4] ss:$8 sps:$4 sm:$0xff]  }
  0x2c   :  { %v51_v49 = vld [vmem:[%s2288_s0] sm:$0xff]  ;;  %v52_v52 = vld [vmem:[%s2288_s0 + $0x8] sm:$0xff]  ;;  %v1917_v56 = vld [vmem:[#allocation2 + $0x1b4] ss:$8 sps:$4 sm:$0xff]   ;;  %v2185_v62 = vmov 1  }
  0x2d   :  { %v1631_v51 = vcombine.high %v51_v49, %v51_v49  ;;  %v1633_v54 = vcombine.high %v52_v52, %v52_v52  ;;  %v545_v55 = vld [vmem:[%s2289_s1] sm:$0xff]  ;;  %v1919_v57 = vld [vmem:[#allocation2 + $0xb0] ss:$8 sps:$4 sm:$0xff]   ;;  %v1927_v0 = vld [vmem:[#allocation2 + $0x94] ss:$8 sps:$4 sm:$0xff]   ;;  %v1630_v11 = vcombine.low %v51_v49, %v51_v49  ;;  %v1632_v12 = vcombine.low %v52_v52, %v52_v52 }
  0x2e   :  { %472 = vmatpush1.bf16.msra.mxu0 %v1871_v20  ;;  %513 = vmatpush1.bf16.msra.mxu1 %v1872_v21  ;;  %v1920_v58 = vld [vmem:[#allocation2 + $0x1b0] ss:$8 sps:$4 sm:$0xff]   ;;  %v1921_v59 = vld [vmem:[#allocation2 + $0xa4] ss:$8 sps:$4 sm:$0xff]   ;;  %v1925_v61 = vld [vmem:[#allocation2 + $0xa0] ss:$8 sps:$4 sm:$0xff]  }
  0x2f   :  { %473 = vmatprep.subr.bf16.mxu0 %v1873_v22  ;;  %514 = vmatprep.subr.bf16.mxu1 %v1875_v23  ;;  %v1923_v60 = vld [vmem:[#allocation2 + $0x1a4] ss:$8 sps:$4 sm:$0xff]   ;;  %v1926_v63 = vld [vmem:[#allocation2 + $0x1a0] ss:$8 sps:$4 sm:$0xff]   ;;  %v1929_v2 = vld [vmem:[#allocation2 + $0x194] ss:$8 sps:$4 sm:$0xff]  }
  0x30   :  { %495 = vmatprep.mubr.bf16.mxu0 %v1631_v51  ;;  %536 = vmatprep.mubr.bf16.mxu1 %v1633_v54  ;;  %v1931_v3 = vld [vmem:[#allocation2 + $0x90] ss:$8 sps:$4 sm:$0xff]   ;;  %v1933_v5 = vld [vmem:[#allocation2 + $0x84] ss:$8 sps:$4 sm:$0xff]   ;;  %v1937_v7 = vld [vmem:[#allocation2 + $0x80] ss:$8 sps:$4 sm:$0xff]  }
  0x31   :  { %549 = vperm.xlu0 %1839, %v545_v55   ;;  %591 = vperm.xlu1 %1841, %v545_v55   ;;  %v1932_v4 = vld [vmem:[#allocation2 + $0x190] ss:$8 sps:$4 sm:$0xff]   ;;  %v1935_v6 = vld [vmem:[#allocation2 + $0x184] ss:$8 sps:$4 sm:$0xff]   ;;  %v1938_v8 = vld [vmem:[#allocation2 + $0x180] ss:$8 sps:$4 sm:$0xff]  }
  0x32   :  { %474 = vmatpush1.bf16.msra.mxu0 %v1877_v24  ;;  %515 = vmatpush1.bf16.msra.mxu1 %v1878_v25  ;;  %v1945_v9 = vld [vmem:[#allocation4 + $0x74] ss:$8 sps:$4 sm:$0xff]   ;;  %v1943_v10 = vld [vmem:[#allocation4 + $0x70] ss:$8 sps:$4 sm:$0xff]   ;;  %v1948_v13 = vld [vmem:[#allocation4 + $0x64] ss:$8 sps:$4 sm:$0xff]  }
  0x33   :  { %475 = vmatprep.subr.bf16.mxu0 %v1879_v26  ;;  %516 = vmatprep.subr.bf16.mxu1 %v1881_v27  ;;  %v1946_v14 = vld [vmem:[#allocation4 + $0x60] ss:$8 sps:$4 sm:$0xff]   ;;  %v1951_v15 = vld [vmem:[#allocation4 + $0x54] ss:$8 sps:$4 sm:$0xff]   ;;  %v1954_v16 = vld [vmem:[#allocation4 + $0x44] ss:$8 sps:$4 sm:$0xff]  }
  0x34   :  { %v1952_v17 = vld [vmem:[#allocation4 + $0x40] ss:$8 sps:$4 sm:$0xff]   ;;  %v1957_v18 = vld [vmem:[#allocation4 + $0x34] ss:$8 sps:$4 sm:$0xff]   ;;  %v1955_v19 = vld [vmem:[#allocation4 + $0x30] ss:$8 sps:$4 sm:$0xff]  }
  0x35   :  { %1840 = vset.pattern.permute.xlu0 %v2185_v62  ;;  %v1960_v20 = vld [vmem:[#allocation4 + $0x24] ss:$8 sps:$4 sm:$0xff]   ;;  %v1958_v21 = vld [vmem:[#allocation4 + $0x20] ss:$8 sps:$4 sm:$0xff]   ;;  %v1963_v22 = vld [vmem:[#allocation4 + $0x14] ss:$8 sps:$4 sm:$0xff]  }
  0x36   :  { %476 = vmatpush1.bf16.msra.mxu0 %v1883_v28  ;;  %517 = vmatpush1.bf16.msra.mxu1 %v1884_v29  ;;  %v1961_v23 = vld [vmem:[#allocation4 + $0x10] ss:$8 sps:$4 sm:$0xff]   ;;  %v1966_v24 = vld [vmem:[#allocation4 + $0x4] ss:$8 sps:$4 sm:$0xff]   ;;  %v1964_v25 = vld [vmem:[#allocation4] ss:$8 sps:$4 sm:$0xff]  }
  0x37   :  { %477 = vmatprep.subr.bf16.mxu0 %v1885_v30  ;;  %518 = vmatprep.subr.bf16.mxu1 %v1887_v31  ;;  %v1969_v26 = vld [vmem:[#allocation4 + $0xf4] ss:$8 sps:$4 sm:$0xff]   ;;  %v1967_v27 = vld [vmem:[#allocation4 + $0xf0] ss:$8 sps:$4 sm:$0xff]   ;;  %v1972_v28 = vld [vmem:[#allocation4 + $0xe4] ss:$8 sps:$4 sm:$0xff]  }
  0x38   :  { %570 = vperm.xlu0 %1840, %v545_v55   ;;  %v1970_v29 = vld [vmem:[#allocation4 + $0xe0] ss:$8 sps:$4 sm:$0xff]   ;;  %v1975_v30 = vld [vmem:[#allocation4 + $0xd4] ss:$8 sps:$4 sm:$0xff]   ;;  %v1973_v31 = vld [vmem:[#allocation4 + $0xd0] ss:$8 sps:$4 sm:$0xff]  }
  0x39   :  { %v2000_v49 = vld [vmem:[#allocation4 + $0x140] ss:$8 sps:$4 sm:$0xff]   ;;  %v2003_v51 = vld [vmem:[#allocation4 + $0x130] ss:$8 sps:$4 sm:$0xff]   ;;  %v2008_v52 = vld [vmem:[#allocation4 + $0x124] ss:$8 sps:$4 sm:$0xff]  }
  0x3a   :  { %478 = vmatpush1.bf16.msra.mxu0 %v1889_v32  ;;  %519 = vmatpush1.bf16.msra.mxu1 %v1890_v33  ;;  %v1978_v32 = vld [vmem:[#allocation4 + $0xc4] ss:$8 sps:$4 sm:$0xff]   ;;  %v1976_v33 = vld [vmem:[#allocation4 + $0xc0] ss:$8 sps:$4 sm:$0xff]   ;;  %v2011_v54 = vld [vmem:[#allocation4 + $0x114] ss:$8 sps:$4 sm:$0xff]  }
  0x3b   :  { %479 = vmatprep.subr.bf16.mxu0 %v1891_v34  ;;  %520 = vmatprep.subr.bf16.mxu1 %v1893_v35  ;;  %v1981_v34 = vld [vmem:[#allocation4 + $0xb4] ss:$8 sps:$4 sm:$0xff]   ;;  %v1979_v35 = vld [vmem:[#allocation4 + $0xb0] ss:$8 sps:$4 sm:$0xff]  }
  0x3c   :  { %1842 = vset.pattern.permute.xlu0 %v2184_v1  ;;  %v1949_v1 = vld [vmem:[#allocation4 + $0x50] ss:$8 sps:$4 sm:$0xff]   ;;  %v2023_v62 = vld [vmem:[#allocation4 + $0x1d4] ss:$8 sps:$4 sm:$0xff]  }
  0x3d   :  { %v2009_v55 = vld [vmem:[#allocation4 + $0x110] ss:$8 sps:$4 sm:$0xff]  }
  0x3e   :  { %480 = vmatpush2.bf16.msra.mxu0 %v1895_v36  ;;  %521 = vmatpush2.bf16.msra.mxu1 %v1896_v37  ;;  %v1984_v36 = vld [vmem:[#allocation4 + $0xa4] ss:$8 sps:$4 sm:$0xff]   ;;  %v1982_v37 = vld [vmem:[#allocation4 + $0xa0] ss:$8 sps:$4 sm:$0xff]  }
  0x3f   :  { %481 = vmatprep.subr.bf16.mxu0 %v1897_v38  ;;  %522 = vmatprep.subr.bf16.mxu1 %v1899_v39  ;;  %v1987_v38 = vld [vmem:[#allocation4 + $0x94] ss:$8 sps:$4 sm:$0xff]   ;;  %v1985_v39 = vld [vmem:[#allocation4 + $0x90] ss:$8 sps:$4 sm:$0xff]  }
  0x42   :  { %482 = vmatpush2.bf16.msra.mxu0 %v1901_v40  ;;  %523 = vmatpush2.bf16.msra.mxu1 %v1902_v41  ;;  %v1990_v40 = vld [vmem:[#allocation4 + $0x84] ss:$8 sps:$4 sm:$0xff]   ;;  %v1988_v41 = vld [vmem:[#allocation4 + $0x80] ss:$8 sps:$4 sm:$0xff]  }
  0x43   :  { %483 = vmatprep.subr.bf16.mxu0 %v1903_v42  ;;  %524 = vmatprep.subr.bf16.mxu1 %v1905_v43  ;;  %v1991_v42 = vld [vmem:[#allocation4 + $0x170] ss:$8 sps:$4 sm:$0xff]   ;;  %v1993_v43 = vld [vmem:[#allocation4 + $0x174] ss:$8 sps:$4 sm:$0xff]  }
  0x46   :  { %484 = vmatpush2.bf16.msra.mxu0 %v1907_v44  ;;  %525 = vmatpush2.bf16.msra.mxu1 %v1908_v45  ;;  %v1996_v44 = vld [vmem:[#allocation4 + $0x164] ss:$8 sps:$4 sm:$0xff]   ;;  %v1994_v45 = vld [vmem:[#allocation4 + $0x160] ss:$8 sps:$4 sm:$0xff]  }
  0x47   :  { %485 = vmatprep.subr.bf16.mxu0 %v1909_v46  ;;  %526 = vmatprep.subr.bf16.mxu1 %v1911_v47  ;;  %v1999_v46 = vld [vmem:[#allocation4 + $0x154] ss:$8 sps:$4 sm:$0xff]   ;;  %v1997_v47 = vld [vmem:[#allocation4 + $0x150] ss:$8 sps:$4 sm:$0xff]  }
  0x4a   :  { %486 = vmatpush2.bf16.msra.mxu0 %v1913_v48  ;;  %527 = vmatpush2.bf16.msra.mxu1 %v1914_v50  ;;  %v2002_v48 = vld [vmem:[#allocation4 + $0x144] ss:$8 sps:$4 sm:$0xff]   ;;  %v2005_v50 = vld [vmem:[#allocation4 + $0x134] ss:$8 sps:$4 sm:$0xff]  }
  0x4b   :  { %487 = vmatprep.subr.bf16.mxu0 %v1915_v53  ;;  %528 = vmatprep.subr.bf16.mxu1 %v1917_v56  ;;  %v2006_v53 = vld [vmem:[#allocation4 + $0x120] ss:$8 sps:$4 sm:$0xff]   ;;  %v2014_v56 = vld [vmem:[#allocation4 + $0x104] ss:$8 sps:$4 sm:$0xff]  }
  0x4e   :  { %488 = vmatpush2.bf16.msra.mxu0 %v1919_v57  ;;  %529 = vmatpush2.bf16.msra.mxu1 %v1920_v58  ;;  %v2012_v57 = vld [vmem:[#allocation4 + $0x100] ss:$8 sps:$4 sm:$0xff]   ;;  %v2017_v58 = vld [vmem:[#allocation4 + $0x1f4] ss:$8 sps:$4 sm:$0xff]  }
  0x4f   :  { %489 = vmatprep.subr.bf16.mxu0 %v1921_v59  ;;  %530 = vmatprep.subr.bf16.mxu1 %v1923_v60  ;;  %v2015_v59 = vld [vmem:[#allocation4 + $0x1f0] ss:$8 sps:$4 sm:$0xff]   ;;  %v2020_v60 = vld [vmem:[#allocation4 + $0x1e4] ss:$8 sps:$4 sm:$0xff]  }
  0x52   :  { %490 = vmatpush2.bf16.msra.mxu0 %v1925_v61  ;;  %531 = vmatpush2.bf16.msra.mxu1 %v1926_v63  ;;  %v2018_v61 = vld [vmem:[#allocation4 + $0x1e0] ss:$8 sps:$4 sm:$0xff]   ;;  %v2021_v63 = vld [vmem:[#allocation4 + $0x1d0] ss:$8 sps:$4 sm:$0xff]  }
  0x53   :  { %491 = vmatprep.subr.bf16.mxu0 %v1927_v0  ;;  %532 = vmatprep.subr.bf16.mxu1 %v1929_v2  ;;  %v2026_v0 = vld [vmem:[#allocation4 + $0x1c4] ss:$8 sps:$4 sm:$0xff]   ;;  %v2024_v2 = vld [vmem:[#allocation4 + $0x1c0] ss:$8 sps:$4 sm:$0xff]  }
  0x56   :  { %492 = vmatpush2.bf16.msra.mxu0 %v1931_v3  ;;  %533 = vmatpush2.bf16.msra.mxu1 %v1932_v4  ;;  %v2029_v3 = vld [vmem:[#allocation4 + $0x1b4] ss:$8 sps:$4 sm:$0xff]   ;;  %v2027_v4 = vld [vmem:[#allocation4 + $0x1b0] ss:$8 sps:$4 sm:$0xff]  }
  0x57   :  { %493 = vmatprep.subr.bf16.mxu0 %v1933_v5  ;;  %534 = vmatprep.subr.bf16.mxu1 %v1935_v6  ;;  %v2032_v5 = vld [vmem:[#allocation4 + $0x1a4] ss:$8 sps:$4 sm:$0xff]   ;;  %v2030_v6 = vld [vmem:[#allocation4 + $0x1a0] ss:$8 sps:$4 sm:$0xff]  }
  0x5a   :  { %494 = vmatpush2.bf16.msra.mxu0 %v1937_v7  ;;  %535 = vmatpush2.bf16.msra.mxu1 %v1938_v8  ;;  %v119_v7 = vlaneseq }
  0x5b   :  { %816 = vmatprep.subr.bf16.mxu0 %v1945_v9  ;;  %1071 = vmatprep.subr.bf16.mxu1 %v1993_v43 }
  0x5c   :  { %v120_v8 = vshrl.u32 %v119_v7, 7  ;;  %v2060_v7 = vld [vmem:[#allocation4 + $0x200] ss:$8 sps:$4 sm:$0xff]  }
  0x5d   :  { %496 = vmatmul.mubr.bf16.vlgmr.msra.gmra.mxu0 %v1630_v11  ;;  %537 = vmatmul.mubr.bf16.vlgmr.msra.gmra.mxu1 %v1632_v12  ;;  %v546_v11 = vld [vmem:[%s2291_s3] ss:$8 sm:$0x3] }
  0x5e   :  { %817 = vmatpush1.bf16.msra.mxu0 %v1943_v10  ;;  %1072 = vmatpush1.bf16.msra.mxu1 %v1991_v42  ;;  %v2238_v9 = vsub.s32 0, %v120_v8  ;;  %v117_v12 = vld [vmem:[%s2293_s5] ss:$8 sm:$0x3] }
  0x5f   :  { %818 = vmatprep.subr.bf16.mxu0 %v1948_v13  ;;  %1073 = vmatprep.subr.bf16.mxu1 %v1996_v44  ;;  %v2246_v13 = vsub.s32 1, %v120_v8  ;;  %v2065_v8 = vld [vmem:[#allocation4 + $0x2f4] ss:$8 sps:$4 sm:$0xff]  }
  0x62   :  { %819 = vmatpush1.bf16.msra.mxu0 %v1946_v14  ;;  %1074 = vmatpush1.bf16.msra.mxu1 %v1994_v45  ;;  %v1698_v14 = vld [vmem:[%s2291_s3 + $0x1] ss:$8 sm:$0x3] }
  0x63   :  { %820 = vmatprep.subr.bf16.mxu0 %v1951_v15  ;;  %1075 = vmatprep.subr.bf16.mxu1 %v1999_v46  ;;  %v556_v15 = vrot.slane %v546_v11, %v2238_v9 }
  0x66   :  { %821 = vmatpush1.bf16.msra.mxu0 %v1949_v1  ;;  %1076 = vmatpush1.bf16.msra.mxu1 %v1997_v47  ;;  %v122_v1 = vrot.slane %v117_v12, %v2238_v9 }
  0x67   :  { %822 = vmatprep.subr.bf16.mxu0 %v1954_v16  ;;  %1077 = vmatprep.subr.bf16.mxu1 %v2002_v48  ;;  %v126_v16 = vrot.slane %v117_v12, %v2246_v13  ;;  %v2066_v12 = vld [vmem:[#allocation4 + $0x2e0] ss:$8 sps:$4 sm:$0xff]  }
  0x6a   :  { %823 = vmatpush1.bf16.msra.mxu0 %v1952_v17  ;;  %1078 = vmatpush1.bf16.msra.mxu1 %v2000_v49  ;;  %v577_v17 = vrot.slane %v1698_v14, %v2238_v9 }
  0x6b   :  { %824 = vmatprep.subr.bf16.mxu0 %v1957_v18  ;;  %1079 = vmatprep.subr.bf16.mxu1 %v2005_v50 }
  0x6e   :  { %825 = vmatpush1.bf16.msra.mxu0 %v1955_v19  ;;  %1080 = vmatpush1.bf16.msra.mxu1 %v2003_v51  ;;  %v1699_v19 = vld [vmem:[%s2291_s3 + $0x2] ss:$8 sm:$0x3]  ;;  %v2035_v51 = vld [vmem:[#allocation4 + $0x194] ss:$8 sps:$4 sm:$0xff]  }
  0x6f   :  { %826 = vmatprep.subr.bf16.mxu0 %v1960_v20  ;;  %1081 = vmatprep.subr.bf16.mxu1 %v2008_v52  ;;  %v2033_v52 = vld [vmem:[#allocation4 + $0x190] ss:$8 sps:$4 sm:$0xff]  }
  0x72   :  { %827 = vmatpush1.bf16.msra.mxu0 %v1958_v21  ;;  %1082 = vmatpush1.bf16.msra.mxu1 %v2006_v53  ;;  %v2038_v53 = vld [vmem:[#allocation4 + $0x184] ss:$8 sps:$4 sm:$0xff]  }
  0x73   :  { %828 = vmatprep.subr.bf16.mxu0 %v1963_v22  ;;  %1083 = vmatprep.subr.bf16.mxu1 %v2011_v54  ;;  %v560_v22 = vrot.slane %v546_v11, %v2246_v13  ;;  %v2036_v54 = vld [vmem:[#allocation4 + $0x180] ss:$8 sps:$4 sm:$0xff]   ;;  %v2068_v11 = vld [vmem:[#allocation4 + $0x2e4] ss:$8 sps:$4 sm:$0xff]  }
  0x76   :  { %829 = vmatpush1.bf16.msra.mxu0 %v1961_v23  ;;  %1084 = vmatpush1.bf16.msra.mxu1 %v2009_v55  ;;  %v2039_v55 = vld [vmem:[#allocation4 + $0x270] ss:$8 sps:$4 sm:$0xff]  }
  0x77   :  { %830 = vmatprep.subr.bf16.mxu0 %v1966_v24  ;;  %1085 = vmatprep.subr.bf16.mxu1 %v2014_v56  ;;  %v2041_v56 = vld [vmem:[#allocation4 + $0x274] ss:$8 sps:$4 sm:$0xff]  }
  0x7a   :  { %831 = vmatpush1.bf16.msra.mxu0 %v1964_v25  ;;  %1086 = vmatpush1.bf16.msra.mxu1 %v2012_v57  ;;  %v581_v25 = vrot.slane %v1698_v14, %v2246_v13  ;;  %v2044_v57 = vld [vmem:[#allocation4 + $0x264] ss:$8 sps:$4 sm:$0xff]   ;;  %v2071_v14 = vld [vmem:[#allocation4 + $0x2d4] ss:$8 sps:$4 sm:$0xff]  }
  0x7b   :  { %832 = vmatprep.subr.bf16.mxu0 %v1969_v26  ;;  %1087 = vmatprep.subr.bf16.mxu1 %v2017_v58  ;;  %v2042_v58 = vld [vmem:[#allocation4 + $0x260] ss:$8 sps:$4 sm:$0xff]  }
  0x7e   :  { %833 = vmatpush2.bf16.msra.mxu0 %v1967_v27  ;;  %1088 = vmatpush2.bf16.msra.mxu1 %v2015_v59  ;;  %v2047_v59 = vld [vmem:[#allocation4 + $0x254] ss:$8 sps:$4 sm:$0xff]  }
  0x7f   :  { %834 = vmatprep.subr.bf16.mxu0 %v1972_v28  ;;  %1089 = vmatprep.subr.bf16.mxu1 %v2020_v60  ;;  %v598_v28 = vrot.slane %v1699_v19, %v2238_v9  ;;  %v2045_v60 = vld [vmem:[#allocation4 + $0x250] ss:$8 sps:$4 sm:$0xff]  }
  0x82   :  { %835 = vmatpush2.bf16.msra.mxu0 %v1970_v29  ;;  %1090 = vmatpush2.bf16.msra.mxu1 %v2018_v61  ;;  %v2050_v61 = vld [vmem:[#allocation4 + $0x244] ss:$8 sps:$4 sm:$0xff]  }
  0x83   :  { %836 = vmatprep.subr.bf16.mxu0 %v1975_v30  ;;  %1091 = vmatprep.subr.bf16.mxu1 %v2023_v62  ;;  %v2048_v62 = vld [vmem:[#allocation4 + $0x240] ss:$8 sps:$4 sm:$0xff]  }
  0x86   :  { %837 = vmatpush2.bf16.msra.mxu0 %v1973_v31  ;;  %1092 = vmatpush2.bf16.msra.mxu1 %v2021_v63  ;;  %v2053_v63 = vld [vmem:[#allocation4 + $0x234] ss:$8 sps:$4 sm:$0xff]  }
  0x87   :  { %838 = vmatprep.subr.bf16.mxu0 %v1978_v32  ;;  %1093 = vmatprep.subr.bf16.mxu1 %v2026_v0  ;;  %v602_v32 = vrot.slane %v1699_v19, %v2246_v13  ;;  %v2051_v0 = vld [vmem:[#allocation4 + $0x230] ss:$8 sps:$4 sm:$0xff]   ;;  %v2080_v19 = vld [vmem:[#allocation4 + $0x2a4] ss:$8 sps:$4 sm:$0xff]  }
  0x8a   :  { %839 = vmatpush2.bf16.msra.mxu0 %v1976_v33  ;;  %1094 = vmatpush2.bf16.msra.mxu1 %v2024_v2  ;;  %v2056_v2 = vld [vmem:[#allocation4 + $0x224] ss:$8 sps:$4 sm:$0xff]  }
  0x8b   :  { %840 = vmatprep.subr.bf16.mxu0 %v1981_v34  ;;  %1095 = vmatprep.subr.bf16.mxu1 %v2029_v3  ;;  %v2054_v3 = vld [vmem:[#allocation4 + $0x220] ss:$8 sps:$4 sm:$0xff]  }
  0x8e   :  { %841 = vmatpush2.bf16.msra.mxu0 %v1979_v35  ;;  %1096 = vmatpush2.bf16.msra.mxu1 %v2027_v4  ;;  %v2059_v4 = vld [vmem:[#allocation4 + $0x214] ss:$8 sps:$4 sm:$0xff]  }
  0x8f   :  { %842 = vmatprep.subr.bf16.mxu0 %v1984_v36  ;;  %1097 = vmatprep.subr.bf16.mxu1 %v2032_v5  ;;  %v2057_v5 = vld [vmem:[#allocation4 + $0x210] ss:$8 sps:$4 sm:$0xff]  }
  0x92   :  { %843 = vmatpush2.bf16.msra.mxu0 %v1982_v37  ;;  %1098 = vmatpush2.bf16.msra.mxu1 %v2030_v6  ;;  %v2062_v6 = vld [vmem:[#allocation4 + $0x204] ss:$8 sps:$4 sm:$0xff]  }
  0x93   :  { %844 = vmatprep.subr.bf16.mxu0 %v1987_v38  ;;  %1099 = vmatprep.subr.bf16.mxu1 %v2035_v51  ;;  %v2102_v51 = vld [vmem:[#allocation4 + $0x320] ss:$8 sps:$4 sm:$0xff]  }
  0x96   :  { %845 = vmatpush2.bf16.msra.mxu0 %v1985_v39  ;;  %1100 = vmatpush2.bf16.msra.mxu1 %v2033_v52  ;;  %v2107_v52 = vld [vmem:[#allocation4 + $0x314] ss:$8 sps:$4 sm:$0xff]  }
  0x97   :  { %846 = vmatprep.subr.bf16.mxu0 %v1990_v40  ;;  %1101 = vmatprep.subr.bf16.mxu1 %v2038_v53  ;;  %v2105_v53 = vld [vmem:[#allocation4 + $0x310] ss:$8 sps:$4 sm:$0xff]  }
  0x9a   :  { %847 = vmatpush2.bf16.msra.mxu0 %v1988_v41  ;;  %1102 = vmatpush2.bf16.msra.mxu1 %v2036_v54  ;;  %v2110_v54 = vld [vmem:[#allocation4 + $0x304] ss:$8 sps:$4 sm:$0xff]  }
  0x9b   :  { %1326 = vmatprep.subr.bf16.mxu0 %v2041_v56  ;;  %v2113_v56 = vld [vmem:[#allocation4 + $0x3f4] ss:$8 sps:$4 sm:$0xff]  }
  0xac   :  { %v550_v10 = vpop.permute.xlu0 %549  ;;  %v592_v33 = vpop.permute.xlu1 %591 }
  0xad   :  { %v563_v23 = vmul.f32 %v556_v15, %v550_v10  ;;  %v564_v36 = vmul.f32 %v560_v22, %v550_v10  ;;  %v605_v40 = vmul.f32 %v598_v28, %v592_v33  ;;  %v606_v45 = vmul.f32 %v602_v32, %v592_v33  ;;  %v2063_v10 = vld [vmem:[#allocation4 + $0x2f0] ss:$8 sps:$4 sm:$0xff]  }
  0xae   :  { %v2069_v15 = vld [vmem:[#allocation4 + $0x2d0] ss:$8 sps:$4 sm:$0xff]  }
  0xb3   :  { %v571_v18 = vpop.permute.xlu0 %570 }
  0xb4   :  { %v584_v31 = vmul.f32 %v577_v17, %v571_v18  ;;  %v585_v39 = vmul.f32 %v581_v25, %v571_v18  ;;  %v2077_v17 = vld [vmem:[#allocation4 + $0x2b4] ss:$8 sps:$4 sm:$0xff]   ;;  %v2075_v18 = vld [vmem:[#allocation4 + $0x2b0] ss:$8 sps:$4 sm:$0xff]  }
 0x11d   :  { %v497_v20 = vpop.f32.mrf.mxu0  ;;  %v538_v21 = vpop.f32.mrf.mxu1 }
 0x11e   :  { %v498_v24 = vadd.f32 %v497_v20, %v122_v1  ;;  %v2074_v1 = vld [vmem:[#allocation4 + $0x2c4] ss:$8 sps:$4 sm:$0xff]   ;;  %v2078_v20 = vld [vmem:[#allocation4 + $0x2a0] ss:$8 sps:$4 sm:$0xff]  }
 0x11f   :  { %v499_v26 = vpop.f32.mrf.mxu0  ;;  %v540_v27 = vpop.f32.mrf.mxu1 }
 0x120   :  { %v539_v29 = vadd.f32 %v538_v21, %v498_v24  ;;  %v500_v30 = vadd.f32 %v499_v26, %v126_v16  ;;  %v2072_v16 = vld [vmem:[#allocation4 + $0x2c0] ss:$8 sps:$4 sm:$0xff]  }
 0x121   :  { %v501_v34 = vpop.f32.mrf.mxu0  ;;  %v542_v35 = vpop.f32.mrf.mxu1  ;;  %v1700_v21 = vld [vmem:[%s2293_s5 + $0x1] ss:$8 sm:$0x3] }
 0x122   :  { %v565_v37 = vadd.f32 %v563_v23, %v539_v29  ;;  %v541_v38 = vadd.f32 %v540_v27, %v500_v30  ;;  %v649_v22 = vrot.slane %v1700_v21, %v2238_v9  ;;  %v653_v23 = vrot.slane %v1700_v21, %v2246_v13  ;;  %v2131_v21 = vld [vmem:[#allocation4 + $0x394] ss:$8 sps:$4 sm:$0xff]  }
 0x123   :  { %v502_v41 = vpop.f32.mrf.mxu0  ;;  %v543_v42 = vpop.f32.mrf.mxu1 }
 0x124   :  { %v566_v43 = vadd.f32 %v564_v36, %v541_v38  ;;  %v586_v44 = vadd.f32 %v584_v31, %v565_v37  ;;  %v2083_v36 = vld [vmem:[#allocation4 + $0x294] ss:$8 sps:$4 sm:$0xff]   ;;  %v2081_v37 = vld [vmem:[#allocation4 + $0x290] ss:$8 sps:$4 sm:$0xff]   ;;  %v2086_v38 = vld [vmem:[#allocation4 + $0x284] ss:$8 sps:$4 sm:$0xff]  }
 0x125   :  { %v2089_v41 = vld [vmem:[#allocation4 + $0x374] ss:$8 sps:$4 sm:$0xff]   ;;  %v2092_v42 = vld [vmem:[#allocation4 + $0x364] ss:$8 sps:$4 sm:$0xff]  }
 0x126   :  { %v587_v46 = vadd.f32 %v585_v39, %v566_v43  ;;  %v607_v47 = vadd.f32 %v605_v40, %v586_v44  ;;  %v2084_v39 = vld [vmem:[#allocation4 + $0x280] ss:$8 sps:$4 sm:$0xff]   ;;  %v2087_v40 = vld [vmem:[#allocation4 + $0x370] ss:$8 sps:$4 sm:$0xff]   ;;  %1581 = vmatprep.subr.bf16.mxu1 %v2089_v41  ;;  %v2095_v44 = vld [vmem:[#allocation4 + $0x354] ss:$8 sps:$4 sm:$0xff]  }
 0x127   :  { %v2090_v43 = vld [vmem:[#allocation4 + $0x360] ss:$8 sps:$4 sm:$0xff]  }
 0x128   :  { %v608_v48 = vadd.f32 %v606_v45, %v587_v46  ;;  %v609_v50 = vpack.c.bf16 %v607_v47, %v607_v47  ;;  %v2093_v45 = vld [vmem:[#allocation4 + $0x350] ss:$8 sps:$4 sm:$0xff]   ;;  %v2098_v46 = vld [vmem:[#allocation4 + $0x344] ss:$8 sps:$4 sm:$0xff]   ;;  %v2096_v47 = vld [vmem:[#allocation4 + $0x340] ss:$8 sps:$4 sm:$0xff]  }
 0x12a   :  { %v610_v49 = vpack.c.bf16 %v608_v48, %v608_v48  ;;  %v2101_v48 = vld [vmem:[#allocation4 + $0x334] ss:$8 sps:$4 sm:$0xff]  }
 0x12c   :  { %848 = vmatprep.mubr.bf16.mxu0 %v610_v49  ;;  %v2099_v49 = vld [vmem:[#allocation4 + $0x330] ss:$8 sps:$4 sm:$0xff]  }
 0x12d   :  { %849 = vmatmul.mubr.bf16.vlgmr.msra.gmra.mxu0 %v609_v50  ;;  %v2104_v50 = vld [vmem:[#allocation4 + $0x324] ss:$8 sps:$4 sm:$0xff]  }
 0x12e   :  { %1327 = vmatpush1.bf16.msra.mxu0 %v2039_v55  ;;  %v2108_v55 = vld [vmem:[#allocation4 + $0x300] ss:$8 sps:$4 sm:$0xff]  }
 0x12f   :  { %1328 = vmatprep.subr.bf16.mxu0 %v2044_v57  ;;  %v2111_v57 = vld [vmem:[#allocation4 + $0x3f0] ss:$8 sps:$4 sm:$0xff]  }
 0x132   :  { %1329 = vmatpush1.bf16.msra.mxu0 %v2042_v58  ;;  %v2116_v58 = vld [vmem:[#allocation4 + $0x3e4] ss:$8 sps:$4 sm:$0xff]  }
 0x133   :  { %1330 = vmatprep.subr.bf16.mxu0 %v2047_v59  ;;  %v2114_v59 = vld [vmem:[#allocation4 + $0x3e0] ss:$8 sps:$4 sm:$0xff]  }
 0x136   :  { %1331 = vmatpush1.bf16.msra.mxu0 %v2045_v60  ;;  %v2119_v60 = vld [vmem:[#allocation4 + $0x3d4] ss:$8 sps:$4 sm:$0xff]  }
 0x137   :  { %1332 = vmatprep.subr.bf16.mxu0 %v2050_v61  ;;  %v2117_v61 = vld [vmem:[#allocation4 + $0x3d0] ss:$8 sps:$4 sm:$0xff]  }
 0x13a   :  { %1333 = vmatpush1.bf16.msra.mxu0 %v2048_v62  ;;  %v2122_v62 = vld [vmem:[#allocation4 + $0x3c4] ss:$8 sps:$4 sm:$0xff]  }
 0x13b   :  { %1334 = vmatprep.subr.bf16.mxu0 %v2053_v63  ;;  %v2120_v63 = vld [vmem:[#allocation4 + $0x3c0] ss:$8 sps:$4 sm:$0xff]  }
 0x13e   :  { %1335 = vmatpush1.bf16.msra.mxu0 %v2051_v0  ;;  %v2125_v0 = vld [vmem:[#allocation4 + $0x3b4] ss:$8 sps:$4 sm:$0xff]  }
 0x13f   :  { %1336 = vmatprep.subr.bf16.mxu0 %v2056_v2  ;;  %v2123_v2 = vld [vmem:[#allocation4 + $0x3b0] ss:$8 sps:$4 sm:$0xff]  }
 0x142   :  { %1337 = vmatpush1.bf16.msra.mxu0 %v2054_v3  ;;  %v2128_v3 = vld [vmem:[#allocation4 + $0x3a4] ss:$8 sps:$4 sm:$0xff]  }
 0x143   :  { %1338 = vmatprep.subr.bf16.mxu0 %v2059_v4  ;;  %v2126_v4 = vld [vmem:[#allocation4 + $0x3a0] ss:$8 sps:$4 sm:$0xff]  }
 0x146   :  { %1339 = vmatpush1.bf16.msra.mxu0 %v2057_v5  ;;  %v1733_v5 = vld [vmem:[%s2293_s5 + $0x2] ss:$8 sm:$0x3] }
 0x147   :  { %1340 = vmatprep.subr.bf16.mxu0 %v2062_v6  ;;  %v904_v6 = vrot.slane %v1733_v5, %v2238_v9 }
 0x14a   :  { %1341 = vmatpush1.bf16.msra.mxu0 %v2060_v7  ;;  %v908_v7 = vrot.slane %v1733_v5, %v2246_v13 }
 0x14b   :  { %1342 = vmatprep.subr.bf16.mxu0 %v2065_v8 }
 0x14e   :  { %1343 = vmatpush2.bf16.msra.mxu0 %v2063_v10 }
 0x14f   :  { %1344 = vmatprep.subr.bf16.mxu0 %v2068_v11 }
 0x152   :  { %1345 = vmatpush2.bf16.msra.mxu0 %v2066_v12 }
 0x153   :  { %1346 = vmatprep.subr.bf16.mxu0 %v2071_v14 }
 0x156   :  { %1347 = vmatpush2.bf16.msra.mxu0 %v2069_v15 }
 0x157   :  { %1348 = vmatprep.subr.bf16.mxu0 %v2074_v1 }
 0x15a   :  { %1349 = vmatpush2.bf16.msra.mxu0 %v2072_v16 }
 0x15b   :  { %1350 = vmatprep.subr.bf16.mxu0 %v2077_v17 }
 0x15e   :  { %1351 = vmatpush2.bf16.msra.mxu0 %v2075_v18 }
 0x15f   :  { %1352 = vmatprep.subr.bf16.mxu0 %v2080_v19 }
 0x162   :  { %1353 = vmatpush2.bf16.msra.mxu0 %v2078_v20 }
 0x163   :  { %1354 = vmatprep.subr.bf16.mxu0 %v2083_v36 }
 0x166   :  { %1355 = vmatpush2.bf16.msra.mxu0 %v2081_v37 }
 0x167   :  { %1356 = vmatprep.subr.bf16.mxu0 %v2086_v38 }
 0x16a   :  { %1357 = vmatpush2.bf16.msra.mxu0 %v2084_v39 }
 0x1ed   :  { %v850_v24 = vpop.f32.mrf.mxu0 }
 0x1ee   :  { %v851_v25 = vadd.f32 %v850_v24, %v649_v22  ;;  %v2129_v22 = vld [vmem:[#allocation4 + $0x390] ss:$8 sps:$4 sm:$0xff]   ;;  %v2132_v24 = vld [vmem:[#allocation4 + $0x380] ss:$8 sps:$4 sm:$0xff]  }
 0x1ef   :  { %v852_v26 = vpop.f32.mrf.mxu0 }
 0x1f0   :  { %vm857_vm0 = vcmp.gt.f32.partialorder %v851_v25, 0.0  ;;  %v859_v27 = vmul.f32 0.2, %v851_v25  ;;  %v853_v28 = vadd.f32 %v852_v26, %v653_v23  ;;  %v2134_v23 = vld [vmem:[#allocation4 + $0x384] ss:$8 sps:$4 sm:$0xff]  }
 0x1f1   :  { %v854_v29 = vpop.f32.mrf.mxu0 }
 0x1f2   :  { %vm858_vm1 = vcmp.gt.f32.partialorder %v853_v28, 0.0  ;;  %v860_v30 = vmul.f32 0.2, %v853_v28  ;;  %v861_v31 = vsel %vm857_vm0, %v851_v25, %v859_v27  ;;  %v1766_v25 = vld [vmem:[%s2293_s5 + $0x3] ss:$8 sm:$0x3] }
 0x1f3   :  { %v855_v32 = vpop.f32.mrf.mxu0  ;;  %v863_v35 = vpack.c.bf16 %v861_v31, %v861_v31  ;;  %v1159_v26 = vrot.slane %v1766_v25, %v2238_v9  ;;  %v1163_v27 = vrot.slane %v1766_v25, %v2246_v13 }
 0x1f4   :  { %v862_v33 = vsel %vm858_vm1, %v853_v28, %v860_v30 }
 0x1f5   :  { %v864_v34 = vpack.c.bf16 %v862_v33, %v862_v33 }
 0x1f7   :  { %1103 = vmatprep.mubr.bf16.mxu1 %v864_v34 }
 0x1f8   :  { %1104 = vmatmul.mubr.bf16.vlgmr.msra.gmra.mxu1 %v863_v35 }
 0x1f9   :  { %1582 = vmatpush1.bf16.msra.mxu1 %v2087_v40  ;;  %v1799_v40 = vld [vmem:[%s2293_s5 + $0x4] ss:$8 sm:$0x3] }
 0x1fa   :  { %1583 = vmatprep.subr.bf16.mxu1 %v2092_v42  ;;  %v1414_v41 = vrot.slane %v1799_v40, %v2238_v9  ;;  %v1418_v42 = vrot.slane %v1799_v40, %v2246_v13 }
 0x1fd   :  { %1584 = vmatpush1.bf16.msra.mxu1 %v2090_v43 }
 0x1fe   :  { %1585 = vmatprep.subr.bf16.mxu1 %v2095_v44 }
 0x201   :  { %1586 = vmatpush1.bf16.msra.mxu1 %v2093_v45 }
 0x202   :  { %1587 = vmatprep.subr.bf16.mxu1 %v2098_v46 }
 0x205   :  { %1588 = vmatpush1.bf16.msra.mxu1 %v2096_v47 }
 0x206   :  { %1589 = vmatprep.subr.bf16.mxu1 %v2101_v48 }
 0x209   :  { %1590 = vmatpush1.bf16.msra.mxu1 %v2099_v49 }
 0x20a   :  { %1591 = vmatprep.subr.bf16.mxu1 %v2104_v50 }
 0x20d   :  { %1592 = vmatpush1.bf16.msra.mxu1 %v2102_v51 }
 0x20e   :  { %1593 = vmatprep.subr.bf16.mxu1 %v2107_v52 }
 0x211   :  { %1594 = vmatpush1.bf16.msra.mxu1 %v2105_v53 }
 0x212   :  { %1595 = vmatprep.subr.bf16.mxu1 %v2110_v54 }
 0x215   :  { %1596 = vmatpush1.bf16.msra.mxu1 %v2108_v55 }
 0x216   :  { %1597 = vmatprep.subr.bf16.mxu1 %v2113_v56 }
 0x219   :  { %1598 = vmatpush2.bf16.msra.mxu1 %v2111_v57 }
 0x21a   :  { %1599 = vmatprep.subr.bf16.mxu1 %v2116_v58 }
 0x21d   :  { %1600 = vmatpush2.bf16.msra.mxu1 %v2114_v59 }
 0x21e   :  { %1601 = vmatprep.subr.bf16.mxu1 %v2119_v60 }
 0x221   :  { %1602 = vmatpush2.bf16.msra.mxu1 %v2117_v61 }
 0x222   :  { %1603 = vmatprep.subr.bf16.mxu1 %v2122_v62 }
 0x225   :  { %1604 = vmatpush2.bf16.msra.mxu1 %v2120_v63 }
 0x226   :  { %1605 = vmatprep.subr.bf16.mxu1 %v2125_v0 }
 0x229   :  { %1606 = vmatpush2.bf16.msra.mxu1 %v2123_v2 }
 0x22a   :  { %1607 = vmatprep.subr.bf16.mxu1 %v2128_v3 }
 0x22d   :  { %1608 = vmatpush2.bf16.msra.mxu1 %v2126_v4 }
 0x22e   :  { %1609 = vmatprep.subr.bf16.mxu1 %v2131_v21 }
 0x231   :  { %1610 = vmatpush2.bf16.msra.mxu1 %v2129_v22 }
 0x232   :  { %1611 = vmatprep.subr.bf16.mxu1 %v2134_v23 }
 0x235   :  { %1612 = vmatpush2.bf16.msra.mxu1 %v2132_v24 }
 0x2b8   :  { %v1105_v8 = vpop.f32.mrf.mxu1 }
 0x2b9   :  { %v1106_v10 = vadd.f32 %v1105_v8, %v904_v6 }
 0x2ba   :  { %v1107_v11 = vpop.f32.mrf.mxu1 }
 0x2bb   :  { %vm1112_vm2 = vcmp.gt.f32.partialorder %v1106_v10, 0.0  ;;  %v1114_v12 = vmul.f32 0.2, %v1106_v10  ;;  %v1108_v14 = vadd.f32 %v1107_v11, %v908_v7 }
 0x2bc   :  { %v1109_v15 = vpop.f32.mrf.mxu1 }
 0x2bd   :  { %vm1113_vm3 = vcmp.gt.f32.partialorder %v1108_v14, 0.0  ;;  %v1115_v1 = vmul.f32 0.2, %v1108_v14  ;;  %v1116_v16 = vsel %vm1112_vm2, %v1106_v10, %v1114_v12 }
 0x2be   :  { %v1110_v17 = vpop.f32.mrf.mxu1  ;;  %v1118_v20 = vpack.c.bf16 %v1116_v16, %v1116_v16 }
 0x2bf   :  { %v1117_v18 = vsel %vm1113_vm3, %v1108_v14, %v1115_v1 }
 0x2c0   :  { %v1119_v19 = vpack.c.bf16 %v1117_v18, %v1117_v18 }
 0x2c2   :  { %1358 = vmatprep.mubr.bf16.mxu0 %v1119_v19 }
 0x2c3   :  { %1359 = vmatmul.mubr.bf16.vlgmr.msra.gmra.mxu0 %v1118_v20 }
 0x383   :  { %v1360_v28 = vpop.f32.mrf.mxu0 }
 0x384   :  { %v1361_v29 = vadd.f32 %v1360_v28, %v1159_v26 }
 0x385   :  { %v1362_v30 = vpop.f32.mrf.mxu0 }
 0x386   :  { %vm1367_vm4 = vcmp.gt.f32.partialorder %v1361_v29, 0.0  ;;  %v1369_v31 = vmul.f32 0.2, %v1361_v29  ;;  %v1363_v32 = vadd.f32 %v1362_v30, %v1163_v27 }
 0x387   :  { %v1364_v33 = vpop.f32.mrf.mxu0 }
 0x388   :  { %vm1368_vm5 = vcmp.gt.f32.partialorder %v1363_v32, 0.0  ;;  %v1370_v34 = vmul.f32 0.2, %v1363_v32  ;;  %v1371_v35 = vsel %vm1367_vm4, %v1361_v29, %v1369_v31 }
 0x389   :  { %v1365_v36 = vpop.f32.mrf.mxu0  ;;  %v1373_v39 = vpack.c.bf16 %v1371_v35, %v1371_v35 }
 0x38a   :  { %v1372_v37 = vsel %vm1368_vm5, %v1363_v32, %v1370_v34 }
 0x38b   :  { %v1374_v38 = vpack.c.bf16 %v1372_v37, %v1372_v37 }
 0x38d   :  { %1613 = vmatprep.mubr.bf16.mxu1 %v1374_v38 }
 0x38e   :  { %1614 = vmatmul.mubr.bf16.vlgmr.msra.gmra.mxu1 %v1373_v39 }
 0x44e   :  { %v1615_v43 = vpop.f32.mrf.mxu1 }
 0x44f   :  { %v1616_v44 = vadd.f32 %v1615_v43, %v1414_v41 }
 0x450   :  { %v1617_v45 = vpop.f32.mrf.mxu1 }
 0x451   :  { %1622 = vst [vmem:[%s2294_s6] sm:$0xff] %v1616_v44  ;;  %v1618_v46 = vadd.f32 %v1617_v45, %v1418_v42 }
 0x452   :  { %v1619_v47 = vpop.f32.mrf.mxu1 }
 0x453   :  { %1623 = vst [vmem:[%s2294_s6 + $0x8] sm:$0xff] %v1618_v46 }
 0x454   :  { %v1620_v48 = vpop.f32.mrf.mxu1 }
 0x455   :  { %1628 = vsyncpa [#allocation3], 1 }
 0x456   :  { %1629 = vsyncpa [#allocation5], 1 }

</bundles_post_ra>
